<compile_context>
chip_gen: v7x
topology: tpu7x:2x2x1
jax: 0.10.0
libtpu: 0.0.40
codegen_flags: <defaults>
</compile_context>

<pallas_src>
import functools

import jax
import jax.numpy as jnp
from jax.experimental import pallas as pl
from jax.experimental.pallas import tpu as pltpu

HIDDEN1 = 128          # layer1 width
HIDDEN2 = 64           # layer2 width (logical)
HIDDEN2_PAD = 128      # layer2 width padded so vregs / MXU K-dim are fully used
SUBLANE = 8            # f32 sublane quantum
LANE = 128             # lane quantum
MAX_BATCH_TILE = 16384  # keeps per-tile VMEM residency <= ~26 MiB (v7x: 64 MiB)


def _round_up(x, m):
    return ((x + m - 1) // m) * m


def _actor_kernel(max_action):
    """Kernel body. All refs are [feature, batch_tile] (batch on lanes)."""

    def kernel(x_ref, w1_ref, w2_ref, b2_ref, w3_ref, b3_ref, out_ref):
        # Layer 1: b1 is folded into W1 (the 1.0 row of x) -> no VPU bias pass.
        h1 = jnp.dot(w1_ref[...], x_ref[...],
                     preferred_element_type=jnp.float32)      # [H1, TB] f32
        h1 = jnp.maximum(h1, 0.0)
        # Layer 2: [H2P, H1] @ [H1, TB] -> [H2P, TB]
        h2 = jnp.dot(w2_ref[...], h1.astype(w2_ref.dtype),
                     preferred_element_type=jnp.float32)
        h2 = jnp.maximum(h2 + b2_ref[...], 0.0)
        # Layer 3: [A, H2P] @ [H2P, TB] -> [A, TB]; only logical rows stored.
        h3 = jnp.dot(w3_ref[...], h2.astype(w3_ref.dtype),
                     preferred_element_type=jnp.float32)
        out_ref[...] = (jnp.tanh(h3 + b3_ref[...]) * max_action
                        ).astype(out_ref.dtype)

    return kernel


def pack_actor_params(params, compute_dtype=jnp.bfloat16):
    """One-off weight packing (call this OUTSIDE the hot path).

    Layout for the batch-on-lanes kernel:
      w1p [H1, SP]  -- b1 folded into column `state_dim`
      w2p [H2P, H1], b2p [H2P, 1] (f32)
      w3p [A, H2P],  b3p [A, 1]  (f32)
    """
    cd = compute_dtype
    state_dim = params["w1"].shape[0]
    action_dim = params["w3"].shape[1]
    sp = _round_up(state_dim + 1, SUBLANE)   # +1 row carries the folded bias

    w1p = jnp.zeros((HIDDEN1, sp), cd)
    w1p = w1p.at[:, :state_dim].set(params["w1"].T.astype(cd))
    w1p = w1p.at[:, state_dim].set(params["b1"].reshape(HIDDEN1).astype(cd))

    w2p = jnp.zeros((HIDDEN2_PAD, HIDDEN1), cd).at[:HIDDEN2, :].set(
        params["w2"].T.astype(cd))
    b2p = jnp.zeros((HIDDEN2_PAD, 1), jnp.float32).at[:HIDDEN2, :].set(
        params["b2"].reshape(HIDDEN2, 1).astype(jnp.float32))

    w3p = jnp.zeros((action_dim, HIDDEN2_PAD), cd).at[:, :HIDDEN2].set(
        params["w3"].T.astype(cd))
    b3p = params["b3"].reshape(action_dim, 1).astype(jnp.float32)

    return {"w1p": w1p, "w2p": w2p, "b2p": b2p, "w3p": w3p, "b3p": b3p}


def _tile_and_pad(batch, batch_tile):
    """Validated, lane-aligned batch tile + padded batch size."""
    bt = _round_up(max(int(batch_tile), 1), LANE)   # guard: multiple of 128
    bt = min(bt, MAX_BATCH_TILE)
    b_lane = _round_up(batch, LANE)
    tb = min(bt, b_lane)
    if b_lane >= 2 * LANE:
        # Prefer >= 2 grid steps so "parallel" actually uses both v7x TCs.
        tb = min(tb, _round_up((b_lane + 1) // 2, LANE))
    b_pad = _round_up(batch, tb)
    return tb, b_pad


@functools.partial(
    jax.jit, static_argnames=("max_action", "batch_tile", "out_dtype"))
def actor_forward_batch_major(state_cols, packed, max_action, *,
                              batch_tile=4096, out_dtype=jnp.float32):
    """Fast path: state_cols is [state_dim, B]; returns [action_dim, B].

    No transpose plumbing — use this when the replay buffer / consumer keep
    data batch-on-lanes.
    """
    state_dim, batch = state_cols.shape
    cd = packed["w1p"].dtype
    sp = packed["w1p"].shape[1]
    action_dim = packed["w3p"].shape[0]

    tb, b_pad = _tile_and_pad(batch, batch_tile)
    grid = (b_pad // tb,)

    # ~1.6 KB of intermediates per batch element; leave headroom for weights
    # and double-buffered I/O.  Raises v5e's 16 MiB scoped default when needed.
    vmem_limit = int(min(48 << 20, max(24 << 20, tb * 2048 + (8 << 20))))

    # Zero-padded, batch-on-lanes state block; row `state_dim` = 1.0 carries b1.
    x_t = jnp.zeros((sp, b_pad), cd)
    x_t = x_t.at[:state_dim, :batch].set(state_cols.astype(cd))
    x_t = x_t.at[state_dim, :].set(1.0)

    out_t = pl.pallas_call(
        _actor_kernel(float(max_action)),
        out_shape=jax.ShapeDtypeStruct((action_dim, b_pad), out_dtype),
        grid_spec=pltpu.PrefetchScalarGridSpec(
            num_scalar_prefetch=0,
            grid=grid,
            in_specs=[
                pl.BlockSpec((sp, tb), lambda i: (0, i)),                  # state tile
                pl.BlockSpec((HIDDEN1, sp), lambda i: (0, 0)),             # W1 (+b1)
                pl.BlockSpec((HIDDEN2_PAD, HIDDEN1), lambda i: (0, 0)),    # W2
                pl.BlockSpec((HIDDEN2_PAD, 1), lambda i: (0, 0)),          # b2
                pl.BlockSpec((action_dim, HIDDEN2_PAD), lambda i: (0, 0)), # W3
                pl.BlockSpec((action_dim, 1), lambda i: (0, 0)),           # b3
            ],
            out_specs=pl.BlockSpec((action_dim, tb), lambda i: (0, i)),
        ),
        compiler_params=pltpu.CompilerParams(
            dimension_semantics=("parallel",),   # shard batch grid over 2 TCs
            vmem_limit_bytes=vmem_limit),
    )(x_t, packed["w1p"], packed["w2p"], packed["b2p"],
      packed["w3p"], packed["b3p"])

    return out_t[:, :batch]


@functools.partial(
    jax.jit,
    static_argnames=("max_action", "compute_dtype", "batch_tile", "out_dtype"))
def actor_forward(state, params, max_action, *, compute_dtype=jnp.bfloat16,
                  batch_tile=4096, out_dtype=jnp.float32):
    """PyTorch-layout convenience wrapper: state [B, state_dim] -> [B, action_dim].

    Adds a transpose on each side; latency-critical callers should use
    pack_actor_params + actor_forward_batch_major directly.
    """
    packed = pack_actor_params(params, compute_dtype)
    out_cols = actor_forward_batch_major(
        state.T, packed, max_action, batch_tile=batch_tile, out_dtype=out_dtype)
    return out_cols.T


def init_actor_params(key, state_dim, action_dim):
    """PyTorch-Linear-style init (uniform +-1/sqrt(fan_in)).

    Weights stored [in_dim, out_dim]; biases [1, out_dim].
    """
    def linear(key, fan_in, fan_out):
        kw, kb = jax.random.split(key)
        bound = 1.0 / jnp.sqrt(fan_in)
        w = jax.random.uniform(kw, (fan_in, fan_out), jnp.float32, -bound, bound)
        b = jax.random.uniform(kb, (1, fan_out), jnp.float32, -bound, bound)
        return w, b

    k1, k2, k3 = jax.random.split(key, 3)
    w1, b1 = linear(k1, state_dim, HIDDEN1)
    w2, b2 = linear(k2, HIDDEN1, HIDDEN2)
    w3, b3 = linear(k3, HIDDEN2, action_dim)
    return {"w1": w1, "b1": b1, "w2": w2, "b2": b2, "w3": w3, "b3": b3}


def actor_reference(state, params, max_action, compute_dtype=jnp.float32):
    """Pure-JAX reference. compute_dtype casts dot inputs (mirrors bf16 MXU).

    b1 is cast like the kernel does (it is folded into the bf16 W1).
    """
    cd = compute_dtype
    b1 = params["b1"].astype(cd).astype(jnp.float32)
    x = jnp.maximum(
        jnp.dot(state.astype(cd), params["w1"].astype(cd),
                preferred_element_type=jnp.float32) + b1, 0.0)
    x = jnp.maximum(
        jnp.dot(x.astype(cd), params["w2"].astype(cd),
                preferred_element_type=jnp.float32) + params["b2"], 0.0)
    x = jnp.dot(x.astype(cd), params["w3"].astype(cd),
                preferred_element_type=jnp.float32) + params["b3"]
    return jnp.tanh(x) * max_action


if __name__ == "__main__":
    # Inverted-pendulum-like sizes: state_dim=3, action_dim=1, max_action=2.0
    state_dim, action_dim, max_action = 3, 1, 2.0

    key = jax.random.PRNGKey(0)
    kp, kx1, kx2 = jax.random.split(key, 3)
    params = init_actor_params(kp, state_dim, action_dim)

    # Case 1: toy batch (single grid step).
    state_small = jax.random.normal(kx1, (4, state_dim), jnp.float32)
    out_small = jax.block_until_ready(
        actor_forward(state_small, params, max_action=max_action))
    assert out_small.shape == (4, action_dim)

    # Case 2: non-aligned batch, multiple grid steps (tiling/padding + the
    # >=2-step megacore split; also exercises the batch_tile rounding guard).
    state_big = jax.random.normal(kx2, (300, state_dim), jnp.float32)
    out_big = jax.block_until_ready(
        actor_forward(state_big, params, max_action=max_action, batch_tile=100))
    assert out_big.shape == (300, action_dim)

    for st, out in ((state_small, out_small), (state_big, out_big)):
        # Tight check vs. a bf16-matched reference (kernel exactness).
        ref_bf16 = actor_reference(st, params, max_action, compute_dtype=jnp.bfloat16)
        assert jnp.allclose(out, ref_bf16, atol=3e-3, rtol=3e-3), (out, ref_bf16)
        # Loose check vs. full-f32 reference (bf16 MXU inputs => small drift).
        ref_f32 = actor_reference(st, params, max_action)
        assert jnp.allclose(out, ref_f32, atol=5e-2, rtol=5e-2), (out, ref_f32)

    # Case 3: batch-major fast path (no transpose plumbing) + bf16 output.
    packed = pack_actor_params(params)
    out_cols = jax.block_until_ready(
        actor_forward_batch_major(state_big.T, packed, max_action,
                                  out_dtype=jnp.bfloat16))
    assert out_cols.shape == (action_dim, 300) and out_cols.dtype == jnp.bfloat16
    ref_big = actor_reference(state_big, params, max_action, jnp.bfloat16)
    assert jnp.allclose(out_cols.T.astype(jnp.float32), ref_big,
                        atol=2e-2, rtol=2e-2), (out_cols, ref_big)

    print("KERNEL_OK")
</pallas_src>

<mosaic_0001>
module attributes {stable_mosaic.version = 11 : i64} {
  func.func @kernel(%arg0: i32, %arg1: memref<8x128xbf16, #tpu.memory_space<vmem>>, %arg2: memref<128x8xbf16, #tpu.memory_space<vmem>>, %arg3: memref<128x128xbf16, #tpu.memory_space<vmem>>, %arg4: memref<128x1xf32, #tpu.memory_space<vmem>>, %arg5: memref<1x128xbf16, #tpu.memory_space<vmem>>, %arg6: memref<1x1xf32, #tpu.memory_space<vmem>>, %arg7: memref<1x128xf32, #tpu.memory_space<vmem>>) attributes {dimension_semantics = [#tpu.dimension_semantics<parallel>], iteration_bounds = array<i64: 1>, scalar_prefetch = 0 : i64, scratch_operands = 0 : i64, tpu.core_type = #tpu.core_type<tc>, window_params = [{transform_indices = @transform_0, window_bounds = array<i64: 8, 128>}, {pipeline_mode = #tpu.pipeline_mode<synchronous>, transform_indices = @transform_1, window_bounds = array<i64: 128, 8>}, {pipeline_mode = #tpu.pipeline_mode<synchronous>, transform_indices = @transform_2, window_bounds = array<i64: 128, 128>}, {pipeline_mode = #tpu.pipeline_mode<synchronous>, transform_indices = @transform_3, window_bounds = array<i64: 128, 1>}, {pipeline_mode = #tpu.pipeline_mode<synchronous>, transform_indices = @transform_4, window_bounds = array<i64: 1, 128>}, {pipeline_mode = #tpu.pipeline_mode<synchronous>, transform_indices = @transform_5, window_bounds = array<i64: 1, 1>}, {transform_indices = @transform_6, window_bounds = array<i64: 1, 128>}]} {
    %c0 = arith.constant 0 : index
    %c0_0 = arith.constant 0 : index
    %0 = vector.load %arg2[%c0, %c0_0] : memref<128x8xbf16, #tpu.memory_space<vmem>>, vector<128x8xbf16>
    %c0_1 = arith.constant 0 : index
    %c0_2 = arith.constant 0 : index
    %1 = vector.load %arg1[%c0_1, %c0_2] : memref<8x128xbf16, #tpu.memory_space<vmem>>, vector<8x128xbf16>
    %cst = arith.constant dense<0.000000e+00> : vector<128x128xf32>
    %2 = tpu.matmul %0, %1, %cst {dimension_numbers = #tpu.dot_dimension_numbers<[1], [0], [0], [1], [0, 0, 1, 1], [], []>} : vector<128x8xbf16>, vector<8x128xbf16>, vector<128x128xf32> -> vector<128x128xf32>
    %cst_3 = arith.constant 0.000000e+00 : f32
    %3 = vector.broadcast %cst_3 : f32 to vector<128x128xf32>
    %4 = arith.maximumf %2, %3 : vector<128x128xf32>
    %c0_4 = arith.constant 0 : index
    %c0_5 = arith.constant 0 : index
    %5 = vector.load %arg3[%c0_4, %c0_5] : memref<128x128xbf16, #tpu.memory_space<vmem>>, vector<128x128xbf16>
    %6 = arith.truncf %4 : vector<128x128xf32> to vector<128x128xbf16>
    %cst_6 = arith.constant dense<0.000000e+00> : vector<128x128xf32>
    %7 = tpu.matmul %5, %6, %cst_6 {dimension_numbers = #tpu.dot_dimension_numbers<[1], [0], [0], [1], [0, 0, 1, 1], [], []>} : vector<128x128xbf16>, vector<128x128xbf16>, vector<128x128xf32> -> vector<128x128xf32>
    %c0_7 = arith.constant 0 : index
    %c0_8 = arith.constant 0 : index
    %8 = vector.load %arg4[%c0_7, %c0_8] : memref<128x1xf32, #tpu.memory_space<vmem>>, vector<128x1xf32>
    %9 = vector.broadcast %8 : vector<128x1xf32> to vector<128x128xf32>
    %10 = arith.addf %7, %9 : vector<128x128xf32>
    %cst_9 = arith.constant 0.000000e+00 : f32
    %11 = vector.broadcast %cst_9 : f32 to vector<128x128xf32>
    %12 = arith.maximumf %10, %11 : vector<128x128xf32>
    %c0_10 = arith.constant 0 : index
    %c0_11 = arith.constant 0 : index
    %13 = vector.load %arg5[%c0_10, %c0_11] : memref<1x128xbf16, #tpu.memory_space<vmem>>, vector<1x128xbf16>
    %14 = arith.truncf %12 : vector<128x128xf32> to vector<128x128xbf16>
    %cst_12 = arith.constant dense<0.000000e+00> : vector<1x128xf32>
    %15 = tpu.matmul %13, %14, %cst_12 {dimension_numbers = #tpu.dot_dimension_numbers<[1], [0], [0], [1], [0, 0, 1, 1], [], []>} : vector<1x128xbf16>, vector<128x128xbf16>, vector<1x128xf32> -> vector<1x128xf32>
    %c0_13 = arith.constant 0 : index
    %c0_14 = arith.constant 0 : index
    %16 = vector.load %arg6[%c0_13, %c0_14] : memref<1x1xf32, #tpu.memory_space<vmem>>, vector<1x1xf32>
    %17 = vector.broadcast %16 : vector<1x1xf32> to vector<1x128xf32>
    %18 = arith.addf %15, %17 : vector<1x128xf32>
    %19 = math.tanh %18 : vector<1x128xf32>
    %cst_15 = arith.constant 2.000000e+00 : f32
    %20 = vector.broadcast %cst_15 : f32 to vector<1x128xf32>
    %21 = arith.mulf %19, %20 : vector<1x128xf32>
    %c0_16 = arith.constant 0 : index
    %c0_17 = arith.constant 0 : index
    %22 = vector.load %arg7[%c0_16, %c0_17] : memref<1x128xf32, #tpu.memory_space<vmem>>, vector<1x128xf32>
    tpu.vector_store %arg7[%c0_16, %c0_17], %21 {strides = array<i32>} : memref<1x128xf32, #tpu.memory_space<vmem>>, vector<1x128xf32>,
    return
  }
  func.func @transform_0(%arg0: i32) -> (i32, i32) {
    %c0_i32 = arith.constant 0 : i32
    %c0_i32_0 = arith.constant 0 : i32
    return %c0_i32, %arg0 : i32, i32
  }
  func.func @transform_1(%arg0: i32) -> (i32, i32) {
    %c0_i32 = arith.constant 0 : i32
    %c0_i32_0 = arith.constant 0 : i32
    %c0_i32_1 = arith.constant 0 : i32
    return %c0_i32, %c0_i32_0 : i32, i32
  }
  func.func @transform_2(%arg0: i32) -> (i32, i32) {
    %c0_i32 = arith.constant 0 : i32
    %c0_i32_0 = arith.constant 0 : i32
    %c0_i32_1 = arith.constant 0 : i32
    return %c0_i32, %c0_i32_0 : i32, i32
  }
  func.func @transform_3(%arg0: i32) -> (i32, i32) {
    %c0_i32 = arith.constant 0 : i32
    %c0_i32_0 = arith.constant 0 : i32
    %c0_i32_1 = arith.constant 0 : i32
    return %c0_i32, %c0_i32_0 : i32, i32
  }
  func.func @transform_4(%arg0: i32) -> (i32, i32) {
    %c0_i32 = arith.constant 0 : i32
    %c0_i32_0 = arith.constant 0 : i32
    %c0_i32_1 = arith.constant 0 : i32
    return %c0_i32, %c0_i32_0 : i32, i32
  }
  func.func @transform_5(%arg0: i32) -> (i32, i32) {
    %c0_i32 = arith.constant 0 : i32
    %c0_i32_0 = arith.constant 0 : i32
    %c0_i32_1 = arith.constant 0 : i32
    return %c0_i32, %c0_i32_0 : i32, i32
  }
  func.func @transform_6(%arg0: i32) -> (i32, i32) {
    %c0_i32 = arith.constant 0 : i32
    %c0_i32_0 = arith.constant 0 : i32
    return %c0_i32, %arg0 : i32, i32
  }
}

</mosaic_0001>

<bundles_post_ra>
// kernel: actor_forward_batch_major.1
= control target key start
LH: loop header
LB: loop body
LE: loop exit
PB: predicated region body
PF: predicated region fallthrough
CT: control target
= control target key end

     0   :  { %s933_s0 = inlined_call_operand.vmem [shape: bf16[8,128], index: 0, kind: input, shape index: {}]   ;;  %s934_s1 = inlined_call_operand.vmem [shape: bf16[128,8], index: 1, kind: input, shape index: {}]   ;;  %s935_s2 = inlined_call_operand.vmem [shape: bf16[128,128], index: 2, kind: input, shape index: {}]   ;;  %s936_s3 = inlined_call_operand.vmem [shape: f32[128,1], index: 3, kind: input, shape index: {}]   ;;  %s937_s4 = inlined_call_operand.vmem [shape: bf16[1,128], index: 4, kind: input, shape index: {}]   ;;  %s938_s5 = inlined_call_operand.<no memory space> [shape: f32[1,1], index: 5, kind: input, shape index: {}]   ;;  %s939_s6 = inlined_call_operand.hbm [shape: f32[1,128], index: 6, kind: output, shape index: {}]  }
   0x1   :  { %v11_v0 = vstv %s938_s5 }
   0x2   :  { %12 = vst [vmem:[#allocation2] sm:$0x1] %v11_v0 }
   0x3   :  { %v43_v1 = vld [vmem:[%s933_s0] sm:$0xf]  ;;  %vm109_vm0 = vcmask 1043456   ;;  %vm84_vm1 = vcmask 64512   ;;  %v719_v4 = vld [vmem:[%s934_s1 + $0x8] sm:$0xff]   ;;  %v720_v5 = vld [vmem:[%s934_s1 + $0x10] sm:$0xff]  }
   0x4   :  { %v718_v2 = vld [vmem:[%s934_s1] sm:$0xff]   ;;  %711 = vmatprep.subr.msk.bf16.mxu0 %vm109_vm0, %v43_v1  ;;  %v111_v3 = vsel %vm109_vm0, %v43_v1, 0  ;;  %v721_v6 = vld [vmem:[%s934_s1 + $0x18] sm:$0xff]  }
   0x5   :  { %642 = vmatpush3.bf16.msra.mxu0 %v111_v3  ;;  %643 = vmatprep.mubr.msk.bf16.mxu0 %vm84_vm1, %v718_v2  ;;  %v722_v7 = vld [vmem:[%s934_s1 + $0x20] sm:$0xff]  }
   0x8   :  { %644 = vmatmul.mubr.msk.bf16.vlgmr.msra.gmra.mrb[0].mxu0 %vm84_vm1, %v719_v4 }
   0x9   :  { %647 = vmatprep.mubr.msk.bf16.mxu0 %vm84_vm1, %v720_v5 }
  0x10   :  { %648 = vmatmul.mubr.msk.bf16.gmra.mrb[4].mxu0 %vm84_vm1, %v721_v6 }
  0x11   :  { %651 = vmatprep.mubr.msk.bf16.mxu0 %vm84_vm1, %v722_v7 }
  0x12   :  { %13 = vsyncpa [#allocation4], 0  ;;  %v723_v8 = vld [vmem:[%s934_s1 + $0x28] sm:$0xff]   ;;  %v724_v9 = vld [vmem:[%s934_s1 + $0x30] sm:$0xff]   ;;  %v760_v14 = vmov 0   ;;  %vm762_vm2 = vmmov 0  }
  0x13   :  { %v725_v10 = vld [vmem:[%s934_s1 + $0x38] sm:$0xff]   ;;  %v726_v11 = vld [vmem:[%s935_s2] sm:$0xff]   ;;  %v252_v13 = vld [vmem:[%s936_s3 + $0x10] sm:$0xff]  ;;  %716 = vset.pattern.permute.xlu0 %v760_v14  ;;  %717 = vset.pattern.permute.xlu1 %v760_v14  ;;  %s763_s9 = smov [#allocation3]  }
  0x14   :  { %675 = vmatprep.mubr.bf16.mxu1 %v726_v11  ;;  %v250_v12 = vld [vmem:[%s936_s3] sm:$0xff]  ;;  %278 = vperm.xlu1 %717, %v252_v13   ;;  %v251_v15 = vld [vmem:[%s936_s3 + $0x8] sm:$0xff]  ;;  %v253_v16 = vld [vmem:[%s936_s3 + $0x18] sm:$0xff]  ;;  %v761_v13 = vmov 0.0   ;;  %s575_s10 = sshll.u32 %s763_s9, 4  ;;  %s576_s10 = int_to_ptr.vmem [resolvable:$true] %s575_s10 }
  0x15   :  { %268 = vperm.xlu0 %716, %v250_v12   ;;  %v254_v17 = vld [vmem:[%s936_s3 + $0x20] sm:$0xff]  ;;  %v255_v18 = vld [vmem:[%s936_s3 + $0x28] sm:$0xff]  ;;  %v256_v19 = vld [vmem:[%s936_s3 + $0x30] sm:$0xff]  ;;  %691 = vmatprep.subr.bf16.mxu0 %v761_v13  ;;  %s736_s11 = scalar_lea.vmem %s576_s10, 16  ;;  %p741_p1 = scmp.lt.s32.totalorder %s576_s10, %s576_s10 }
  0x16   :  { %v257_v20 = vld [vmem:[%s936_s3 + $0x38] sm:$0xff]  ;;  %v258_v21 = vld [vmem:[%s936_s3 + $0x40] sm:$0xff]  ;;  %v259_v22 = vld [vmem:[%s936_s3 + $0x48] sm:$0xff]  ;;  %p737_p0 = scmp.ne.s32.totalorder %s576_s10, %s736_s11 }
  0x17   :  { %v260_v23 = vld [vmem:[%s936_s3 + $0x50] sm:$0xff]  ;;  %v261_v24 = vld [vmem:[%s936_s3 + $0x58] sm:$0xff]  ;;  %v262_v25 = vld [vmem:[%s936_s3 + $0x60] sm:$0xff] }
  0x18   :  { %652 = vmatmul.mubr.msk.bf16.gmra.mrb[8].mxu0 %vm84_vm1, %v723_v8  ;;  %283 = vperm.xlu1 %717, %v253_v16   ;;  %v263_v26 = vld [vmem:[%s936_s3 + $0x68] sm:$0xff]  ;;  %v264_v27 = vld [vmem:[%s936_s3 + $0x70] sm:$0xff]  ;;  %v265_v28 = vld [vmem:[%s936_s3 + $0x78] sm:$0xff] }
  0x19   :  { %655 = vmatprep.mubr.msk.bf16.mxu0 %vm84_vm1, %v724_v9  ;;  %273 = vperm.xlu0 %716, %v251_v15   ;;  %v516_v29 = vld [vmem:[#allocation2] sm:$0x1]  ;;  %v727_v6 = vld [vmem:[%s935_s2 + $0x8] sm:$0xff]   ;;  %v728_v7 = vld [vmem:[%s935_s2 + $0x10] sm:$0xff]  }
  0x1a   :  { %v729_v8 = vld [vmem:[%s935_s2 + $0x18] sm:$0xff]   ;;  %v730_v9 = vld [vmem:[%s935_s2 + $0x20] sm:$0xff]   ;;  %v732_v11 = vld [vmem:[%s935_s2 + $0x30] sm:$0xff]  }
  0x1b   :  { %v733_v12 = vld [vmem:[%s935_s2 + $0x38] sm:$0xff]  }
  0x1c   :  { %293 = vperm.xlu1 %717, %v255_v18  }
  0x1d   :  { %288 = vperm.xlu0 %716, %v254_v17  }
  0x20   :  { %656 = vmatmul.mubr.msk.bf16.gmra.mrb[12].mxu0 %vm84_vm1, %v725_v10  ;;  %303 = vperm.xlu1 %717, %v257_v20   ;;  %v731_v10 = vld [vmem:[%s935_s2 + $0x28] sm:$0xff]  }
  0x21   :  { %298 = vperm.xlu0 %716, %v256_v19   ;;  %707 = vmatprep.mubr.msk.bf16.mxu0 %vm762_vm2, %v761_v13 }
  0x24   :  { %313 = vperm.xlu1 %717, %v259_v22  }
  0x25   :  { %308 = vperm.xlu0 %716, %v258_v21  }
  0x28   :  { %323 = vperm.xlu1 %717, %v261_v24  }
  0x29   :  { %318 = vperm.xlu0 %716, %v260_v23  }
  0x2c   :  { %333 = vperm.xlu1 %717, %v263_v26  }
  0x2d   :  { %328 = vperm.xlu0 %716, %v262_v25  }
  0x30   :  { %343 = vperm.xlu1 %717, %v265_v28  }
  0x31   :  { %338 = vperm.xlu0 %716, %v264_v27  }
  0x35   :  { %519 = vperm.xlu0 %716, %v516_v29  }
  0x93   :  { %v279_v15 = vpop.permute.xlu1 %278 }
  0x94   :  { %v269_v14 = vpop.permute.xlu0 %268 }
  0x97   :  { %v284_v17 = vpop.permute.xlu1 %283 }
  0x98   :  { %v274_v16 = vpop.permute.xlu0 %273 }
  0x9b   :  { %v294_v19 = vpop.permute.xlu1 %293 }
  0x9c   :  { %v289_v18 = vpop.permute.xlu0 %288 }
  0x9f   :  { %v304_v24 = vpop.permute.xlu1 %303 }
  0xa0   :  { %v299_v20 = vpop.permute.xlu0 %298 }
  0xdb   :  { %v645_v30 = vpop.f32.mrb[0].mxu0 }
  0xdc   :  { %v147_v31 = vpop.f32.mrb[1].mxu0  ;;  %v212_v33 = vmax.f32 %v645_v30, 0.0 }
  0xdd   :  { %v646_v32 = vpop.f32.mrb[2].mxu0  ;;  %v210_v36 = vmax.f32 %v147_v31, 0.0 }
  0xde   :  { %v213_v34 = vmax.f32 %v646_v32, 0.0  ;;  %v150_v35 = vpop.f32.mrb[3].mxu0  ;;  %v309_v32 = vpop.permute.xlu0 %308 }
  0xdf   :  { %v211_v37 = vmax.f32 %v150_v35, 0.0 }
  0xe0   :  { %v243_v38 = vpack.c.bf16 %v213_v34, %v212_v33 }
  0xe1   :  { %v242_v39 = vpack.c.bf16 %v211_v37, %v210_v36  ;;  %v314_v36 = vpop.permute.xlu1 %313 }
  0xe3   :  { %v649_v40 = vpop.f32.mrb[4].mxu0  ;;  %659 = vmatprep.subr.bf16.mxu1 %v242_v39 }
  0xe4   :  { %v163_v41 = vpop.f32.mrb[5].mxu0  ;;  %660 = vmatpush3.bf16.msra.mxu1 %v242_v39  ;;  %v216_v43 = vmax.f32 %v649_v40, 0.0 }
  0xe5   :  { %v650_v42 = vpop.f32.mrb[6].mxu0  ;;  %661 = vmatprep.subr.bf16.mxu1 %v243_v38  ;;  %v214_v46 = vmax.f32 %v163_v41, 0.0 }
  0xe6   :  { %v217_v44 = vmax.f32 %v650_v42, 0.0  ;;  %v166_v45 = vpop.f32.mrb[7].mxu0 }
  0xe7   :  { %v215_v47 = vmax.f32 %v166_v45, 0.0  ;;  %v319_v45 = vpop.permute.xlu0 %318 }
  0xe8   :  { %v245_v48 = vpack.c.bf16 %v217_v44, %v216_v43  ;;  %662 = vmatpush3.bf16.msra.mxu1 %v243_v38 }
  0xe9   :  { %v244_v49 = vpack.c.bf16 %v215_v47, %v214_v46 }
  0xeb   :  { %v653_v50 = vpop.f32.mrb[8].mxu0  ;;  %663 = vmatprep.subr.bf16.mxu1 %v244_v49 }
  0xec   :  { %v179_v51 = vpop.f32.mrb[9].mxu0  ;;  %664 = vmatpush3.bf16.msra.mxu1 %v244_v49  ;;  %v220_v53 = vmax.f32 %v653_v50, 0.0  ;;  %v324_v49 = vpop.permute.xlu1 %323 }
  0xed   :  { %v654_v52 = vpop.f32.mrb[10].mxu0  ;;  %665 = vmatprep.subr.bf16.mxu1 %v245_v48  ;;  %v218_v56 = vmax.f32 %v179_v51, 0.0 }
  0xee   :  { %v221_v54 = vmax.f32 %v654_v52, 0.0  ;;  %v182_v55 = vpop.f32.mrb[11].mxu0 }
  0xef   :  { %v219_v57 = vmax.f32 %v182_v55, 0.0 }
  0xf0   :  { %v247_v58 = vpack.c.bf16 %v221_v54, %v220_v53  ;;  %666 = vmatpush3.bf16.msra.mxu1 %v245_v48 }
  0xf1   :  { %v246_v59 = vpack.c.bf16 %v219_v57, %v218_v56  ;;  %v329_v57 = vpop.permute.xlu0 %328 }
  0xf3   :  { %v657_v60 = vpop.f32.mrb[12].mxu0  ;;  %667 = vmatprep.subr.bf16.mxu1 %v246_v59 }
  0xf4   :  { %v195_v61 = vpop.f32.mrb[13].mxu0  ;;  %668 = vmatpush3.bf16.msra.mxu1 %v246_v59  ;;  %v224_v63 = vmax.f32 %v657_v60, 0.0 }
  0xf5   :  { %v658_v62 = vpop.f32.mrb[14].mxu0  ;;  %669 = vmatprep.subr.bf16.mxu1 %v247_v58  ;;  %v222_v2 = vmax.f32 %v195_v61, 0.0 }
  0xf6   :  { %v225_v0 = vmax.f32 %v658_v62, 0.0  ;;  %v198_v1 = vpop.f32.mrb[15].mxu0  ;;  %v334_v62 = vpop.permute.xlu1 %333 }
  0xf7   :  { %v223_v3 = vmax.f32 %v198_v1, 0.0 }
  0xf8   :  { %v249_v4 = vpack.c.bf16 %v225_v0, %v224_v63  ;;  %670 = vmatpush3.bf16.msra.mxu1 %v247_v58 }
  0xf9   :  { %v248_v5 = vpack.c.bf16 %v223_v3, %v222_v2 }
  0xfb   :  { %671 = vmatprep.subr.bf16.mxu1 %v248_v5 }
  0xfc   :  { %672 = vmatpush3.bf16.msra.mxu1 %v248_v5  ;;  %v339_v5 = vpop.permute.xlu0 %338 }
  0xfd   :  { %673 = vmatprep.subr.bf16.mxu1 %v249_v4 }
 0x100   :  { %674 = vmatpush3.bf16.msra.mxu1 %v249_v4 }
 0x103   :  { %676 = vmatmul.mubr.bf16.vlgmr.msra.gmra.mrb[0].mxu1 %v727_v6 }
 0x104   :  { %679 = vmatprep.mubr.bf16.mxu1 %v728_v7 }
 0x10b   :  { %680 = vmatmul.mubr.bf16.gmra.mrb[4].mxu1 %v729_v8 }
 0x10c   :  { %683 = vmatprep.mubr.bf16.mxu1 %v730_v9 }
 0x113   :  { %684 = vmatmul.mubr.bf16.gmra.mrb[8].mxu1 %v731_v10  ;;  %v344_v10 = vpop.permute.xlu1 %343 }
 0x114   :  { %687 = vmatprep.mubr.bf16.mxu1 %v732_v11 }
 0x11b   :  { %688 = vmatmul.mubr.bf16.gmra.mrb[12].mxu1 %v733_v12 }
 0x1d6   :  { %v677_v21 = vpop.f32.mrb[0].mxu1 }
 0x1d7   :  { %v437_v22 = vadd.f32 %v677_v21, %v279_v15  ;;  %v428_v23 = vpop.f32.mrb[1].mxu1 }
 0x1d8   :  { %v429_v25 = vadd.f32 %v428_v23, %v269_v14  ;;  %v678_v26 = vpop.f32.mrb[2].mxu1  ;;  %v507_v23 = vld [vmem:[%s937_s4] sm:$0x1]  ;;  %s740_s4 = scalar_lea.vmem %s576_s10, 32 }
 0x1d9   :  { %v440_v27 = vadd.f32 %v678_v26, %v284_v17  ;;  %v431_v28 = vpop.f32.mrb[3].mxu1  ;;  %v493_v30 = vmax.f32 %v437_v22, 0.0  ;;  %p742_p2 = scmp.lt.s32.totalorder %s740_s4, %s736_s11 }
 0x1da   :  { %v432_v29 = vadd.f32 %v431_v28, %v274_v16  ;;  %v491_v33 = vmax.f32 %v429_v25, 0.0 }
 0x1db   :  { %v494_v31 = vmax.f32 %v440_v27, 0.0  ;;  %v520_v27 = vpop.permute.xlu0 %519  ;;  %p743_p3 = por %p742_p2, %p741_p1 }
 0x1dc   :  { %v492_v34 = vmax.f32 %v432_v29, 0.0 }
 0x1dd   :  { %v509_v35 = vpack.c.bf16 %v494_v31, %v493_v30  ;;  %p744_p4 = pnand %p743_p3, %p737_p0 }
 0x1de   :  { %v508_v37 = vpack.c.bf16 %v492_v34, %v491_v33  ;;  %v681_v38 = vpop.f32.mrb[4].mxu1 }
 0x1df   :  { %v453_v39 = vadd.f32 %v681_v38, %v299_v20  ;;  %v444_v40 = vpop.f32.mrb[5].mxu1 }
 0x1e0   :  { %v445_v41 = vadd.f32 %v444_v40, %v289_v18  ;;  %v682_v42 = vpop.f32.mrb[6].mxu1  ;;  %692 = vmatpush3.bf16.msra.mxu0 %v508_v37 }
 0x1e1   :  { %v456_v43 = vadd.f32 %v682_v42, %v304_v24  ;;  %v447_v44 = vpop.f32.mrb[7].mxu1  ;;  %693 = vmatprep.subr.bf16.mxu0 %v761_v13  ;;  %v497_v47 = vmax.f32 %v453_v39, 0.0  ;;  %v522_v24 = vlaneseq }
 0x1e2   :  { %v448_v46 = vadd.f32 %v447_v44, %v294_v19  ;;  %v495_v50 = vmax.f32 %v445_v41, 0.0 }
 0x1e3   :  { %v498_v48 = vmax.f32 %v456_v43, 0.0  ;;  %v523_v25 = vshrl.u32 %v522_v24, 7 }
 0x1e4   :  { %v496_v51 = vmax.f32 %v448_v46, 0.0  ;;  %694 = vmatpush3.bf16.msra.mxu0 %v509_v35 }
 0x1e5   :  { %v511_v52 = vpack.c.bf16 %v498_v48, %v497_v47  ;;  %695 = vmatprep.subr.bf16.mxu0 %v761_v13  ;;  %v524_v26 = vsub.s32 0, %v523_v25 }
 0x1e6   :  { %v510_v53 = vpack.c.bf16 %v496_v51, %v495_v50  ;;  %v685_v54 = vpop.f32.mrb[8].mxu1 }
 0x1e7   :  { %v469_v55 = vadd.f32 %v685_v54, %v319_v45  ;;  %v460_v56 = vpop.f32.mrb[9].mxu1  ;;  %v525_v28 = vrot.slane %v520_v27, %v524_v26 }
 0x1e8   :  { %v461_v58 = vadd.f32 %v460_v56, %v309_v32  ;;  %v686_v59 = vpop.f32.mrb[10].mxu1  ;;  %696 = vmatpush3.bf16.msra.mxu0 %v510_v53 }
 0x1e9   :  { %v472_v60 = vadd.f32 %v686_v59, %v324_v49  ;;  %v463_v61 = vpop.f32.mrb[11].mxu1  ;;  %697 = vmatprep.subr.bf16.mxu0 %v761_v13  ;;  %v501_v0 = vmax.f32 %v469_v55, 0.0 }
 0x1ea   :  { %v464_v63 = vadd.f32 %v463_v61, %v314_v36  ;;  %v499_v2 = vmax.f32 %v461_v58, 0.0 }
 0x1eb   :  { %v502_v1 = vmax.f32 %v472_v60, 0.0 }
 0x1ec   :  { %v500_v3 = vmax.f32 %v464_v63, 0.0  ;;  %698 = vmatpush3.bf16.msra.mxu0 %v511_v52 }
 0x1ed   :  { %v513_v4 = vpack.c.bf16 %v502_v1, %v501_v0  ;;  %699 = vmatprep.subr.bf16.mxu0 %v761_v13 }
 0x1ee   :  { %v512_v6 = vpack.c.bf16 %v500_v3, %v499_v2  ;;  %v689_v7 = vpop.f32.mrb[12].mxu1 }
 0x1ef   :  { %v485_v8 = vadd.f32 %v689_v7, %v339_v5  ;;  %v476_v9 = vpop.f32.mrb[13].mxu1 }
 0x1f0   :  { %v477_v11 = vadd.f32 %v476_v9, %v329_v57  ;;  %v690_v12 = vpop.f32.mrb[14].mxu1  ;;  %700 = vmatpush3.bf16.msra.mxu0 %v512_v6 }
 0x1f1   :  { %v488_v14 = vadd.f32 %v690_v12, %v344_v10  ;;  %v479_v15 = vpop.f32.mrb[15].mxu1  ;;  %701 = vmatprep.subr.bf16.mxu0 %v761_v13  ;;  %v505_v17 = vmax.f32 %v485_v8, 0.0 }
 0x1f2   :  { %v480_v16 = vadd.f32 %v479_v15, %v334_v62  ;;  %v503_v19 = vmax.f32 %v477_v11, 0.0 }
 0x1f3   :  { %v506_v18 = vmax.f32 %v488_v14, 0.0 }
 0x1f4   :  { %v504_v20 = vmax.f32 %v480_v16, 0.0  ;;  %702 = vmatpush3.bf16.msra.mxu0 %v513_v4 }
 0x1f5   :  { %v515_v21 = vpack.c.bf16 %v506_v18, %v505_v17  ;;  %703 = vmatprep.subr.bf16.mxu0 %v761_v13 }
 0x1f6   :  { %v514_v22 = vpack.c.bf16 %v504_v20, %v503_v19 }
 0x1f8   :  { %704 = vmatpush3.bf16.msra.mxu0 %v514_v22 }
 0x1f9   :  { %705 = vmatprep.subr.bf16.mxu0 %v761_v13 }
 0x1fc   :  { %706 = vmatpush3.bf16.msra.mxu0 %v515_v21 }
 0x1ff   :  { %708 = vmatmul.mubr.bf16.vlgmr.msra.gmra.mrb[16].mxu0 %v507_v23 }
 0x2d2   :  { %v560_v29 = vpop.f32.mrb[16].mxu0 }
 0x2d3   :  { %v561_v30 = vadd.f32 %v560_v29, %v525_v28  ;;  %v709_v31 = vpop.f32.mrb[17].mxu0 }
 0x2d4   :  { %v563_v32 = vpop.f32.mrb[18].mxu0 }
 0x2d5   :  { %734 = vtanh.f32 %v561_v30  ;;  %v710_v33 = vpop.f32.mrb[19].mxu0 }
 0x2df   :  { %v735_v13 = vpop.eup %734 }
 0x2e0   :  { %v567_v34 = vmul.f32 2.0, %v735_v13 }
 0x2e2   :  { %568 = vst [vmem:[#allocation3] sm:$0x1] %v567_v34 }
 0x2e3   :  { %747 = shalt.err (!%p744_p4)
}
 0x2e4   :  { %s748_s14 = scalar_lea.hbm %s939_s6, 16 }
 0x2e5   :  { %p749_p5 = scmp.ne.s32.totalorder %s939_s6, %s748_s14  ;;  %p752_p6 = scmp.lt.u32.totalorder %s748_s14, %s939_s6 }
 0x2e7   :  { %p754_p7 = pnand %p752_p6, %p749_p5 }
 0x2e9   :  { %757 = shalt.err (!%p754_p7)
}
 0x2ea   :  { %578 = dma.vmem_to_hbm [thread:$0]  %s576_s10, 16, %s939_s6, [#allocation4]  }
 0x2eb   :  { %758 = dma.done.wait [#allocation4], 16  }
 0x2ec   :  { %759 = vsyncadd [#allocation4], 4294967280 }
 0x2ed   :  { %582 = vsyncpa [#allocation4], 1 }

</bundles_post_ra>
